<compile_context>
chip_gen: v5e
topology: v5e:2x2
jax: 0.10.0
libtpu: 0.0.40
codegen_flags: <defaults>
</compile_context>

<pallas_src>
import functools

import jax
import jax.numpy as jnp
import numpy as np
from jax.experimental import pallas as pl
from jax.experimental.pallas import tpu as pltpu

_PERIOD = 24  # lcm(3 interleaved convs, 8 sublanes)


def _round_up(n, m):
    return ((n + m - 1) // m) * m


def _vmem_capacity_bytes(default=64 * 1024 * 1024):
    """Generation-aware VMEM capacity (v5e/v6e: 128 MiB, v7x: 64 MiB per core)."""
    try:
        info = pltpu.get_tpu_info()
        cap = int(getattr(info, "vmem_capacity_bytes", 0))
        return cap if cap > 0 else default
    except Exception:
        return default


def _tile_time(v, reps):
    """Tile a (..., 24, Hp) array to (..., 24*reps, Hp) along the sublane axis."""
    if reps == 1:
        return v
    return jnp.concatenate([v] * reps, axis=-2)


def _convolution_kernel(x_ref, wsel_ref, bsel_ref, fcw_ref, fcb_ref, out_ref,
                        *, window_size, conv_proj, time_reps, mxu_dtype):
    """One (B_blk, Tp, Hp) batch slab per grid step.

    x_ref   : (B_blk, W-1+Tp, Hp)  causally padded input slab (f32 or bf16)
    wsel_ref: (W, 24, Hp) f32      per-timestep pre-selected depthwise conv weights
    bsel_ref: (24, Hp)    f32      per-timestep pre-selected conv biases
    fcw_ref : (Hp, Hp)    mxu_dtype  fc weight, pre-transposed (y = x @ fcw + fcb)
    fcb_ref : (1, Hp)     f32      fc bias
    out_ref : (B_blk, Tp, Hp)
    """
    Bblk, Tp, Hp = out_ref.shape
    W = window_size

    # Period-24 pre-selected conv params, tiled once to Tp rows (identity if Tp==24).
    wsel = _tile_time(wsel_ref[...], time_reps)          # (W, Tp, Hp)
    bias = _tile_time(bsel_ref[...], time_reps)          # (Tp, Hp)

    # Depthwise causal conv, weights already selected per t (= t % 3):
    #   acc[b,t,c] = b_sel[t,c] + sum_k w_sel[k,t,c] * xpad[b, t+k, c]
    # Bias broadcast hoisted out of the unrolled k-loop; shifted windows are read
    # directly from the Ref (no sublane-misaligned value-slice relayouts).
    acc = jnp.broadcast_to(bias[None, :, :], (Bblk, Tp, Hp)).astype(jnp.float32)
    for k in range(W):                                   # static unroll, W is small
        xk = x_ref[:, pl.ds(k, Tp), :].astype(jnp.float32)
        acc = acc + wsel[k][None, :, :] * xk

    if conv_proj:
        # nn.Linear on the whole slab as one MXU matmul, f32 accumulation.
        y = jnp.dot(acc.reshape(Bblk * Tp, Hp).astype(mxu_dtype),
                    fcw_ref[...],
                    preferred_element_type=jnp.float32)
        y = y + fcb_ref[...]
        acc = y.reshape(Bblk, Tp, Hp)
        # TODO(synk): nn.Dropout(0.1) is identity in eval mode; training-mode dropout
        # (random mask + 1/0.9 scale) is not implemented.

    out_ref[...] = acc.astype(out_ref.dtype)


def convolution_forward(x, conv_w, conv_b, fc_w, fc_b, *, window_size,
                        conv_proj=True, batch_block=None,
                        input_dtype=None, out_dtype=None, use_bf16_matmul=False):
    """x: (B, T, H); conv_w: (3, W, H); conv_b: (3, H);
    fc_w: (H, H) [torch (out, in) layout]; fc_b: (H,).

    input_dtype / out_dtype: optional narrower DMA dtypes (e.g. jnp.bfloat16) to
    halve HBM traffic in this bandwidth-bound kernel. use_bf16_matmul: feed the fc
    MXU matmul in bf16 (f32 accumulate). Defaults keep full f32 torch parity.
    """
    B, T, H = x.shape
    W = window_size

    in_dtype = jnp.dtype(input_dtype) if input_dtype is not None else x.dtype
    o_dtype = jnp.dtype(out_dtype) if out_dtype is not None else x.dtype
    mxu_dtype = jnp.bfloat16 if use_bf16_matmul else jnp.float32

    Hp = _round_up(H, 128)              # lane-dense
    Tp = _round_up(T, _PERIOD)          # sublane-dense AND a whole number of t%3 periods
    Tin = (W - 1) + Tp                  # causal head pad + alignment tail pad
    time_reps = Tp // _PERIOD

    # ---- generation-aware VMEM budget & corrected per-step accounting -------------
    vmem_cap = _vmem_capacity_bytes()
    # v5e/v6e (128 MiB) -> 96 MiB limit; v7x (64 MiB) -> 48 MiB limit.
    vmem_limit = min(vmem_cap * 3 // 4, 96 * 1024 * 1024)
    usable = int(vmem_limit * 0.7)      # headroom for compiler scratch / misc

    x_bytes = jnp.dtype(in_dtype).itemsize
    out_bytes = jnp.dtype(o_dtype).itemsize
    mxu_bytes = jnp.dtype(mxu_dtype).itemsize

    # Grid-invariant buffers (conv params, fc params; x2 for worst-case buffering)
    # plus the in-kernel tiled copies of wsel/bsel ((W+1)*Tp*Hp f32 values).
    fixed = 2 * (W + 1) * _PERIOD * Hp * 4
    fixed += (W + 1) * Tp * Hp * 4
    if conv_proj:
        fixed += 2 * (Hp * Hp * mxu_bytes + Hp * 4)

    # Per-batch-element cost: double-buffered x/out blocks + slab-sized compute
    # temporaries (f32 x slice, f32 acc, MXU-dtype acc copy, f32 matmul result).
    per_batch = 2 * Tin * Hp * x_bytes + 2 * Tp * Hp * out_bytes
    temp_bytes = 4 + 4 + ((mxu_bytes + 4) if conv_proj else 0)
    per_batch += temp_bytes * Tp * Hp

    if batch_block is None:
        batch_block = max(1, (usable - fixed) // per_batch)
        if B > 1:
            # Keep >= 2 grid steps so megacore parts can shard across TensorCores.
            # (This also makes batch_block*Tp, the MXU M dimension, as large as the
            #  VMEM / grid-step constraints allow — no extra MXU-row floor needed.)
            batch_block = min(batch_block, -(-B // 2))
    batch_block = max(1, min(int(batch_block), B))
    Bp = _round_up(B, batch_block)

    # ---- wrapper-side glue (plain JAX) ---------------------------------------------
    # Single fused pad: batch round-up, causal left pad + T alignment, H lane pad.
    xp = jnp.pad(x, ((0, Bp - B), (W - 1, Tp - T), (0, Hp - H))).astype(in_dtype)

    # Pre-select per-timestep conv params (t % 3 -> rtg/obs/act) for ONE period of
    # lcm(3, 8) = 24 rows (O(1) in T); the kernel tiles them to Tp rows.
    tmod = jnp.arange(_PERIOD) % 3
    w_sel = jnp.transpose(conv_w.astype(jnp.float32)[tmod], (1, 0, 2))       # (W, 24, H)
    w_sel = jnp.pad(w_sel, ((0, 0), (0, 0), (0, Hp - H)))                     # (W, 24, Hp)
    b_sel = jnp.pad(conv_b.astype(jnp.float32)[tmod], ((0, 0), (0, Hp - H)))  # (24, Hp)

    # FC weight transposed (y = x @ W.T + b), zero-padded, cast for the MXU.
    fc_wT = jnp.pad(fc_w.astype(jnp.float32).T,
                    ((0, Hp - H), (0, Hp - H))).astype(mxu_dtype)             # (Hp, Hp)
    fc_b2 = jnp.pad(fc_b.astype(jnp.float32), (0, Hp - H)).reshape(1, Hp)     # (1, Hp)
    # -----------------------------------------------------------------------------------

    kernel = functools.partial(_convolution_kernel, window_size=W,
                               conv_proj=conv_proj, time_reps=time_reps,
                               mxu_dtype=mxu_dtype)

    out = pl.pallas_call(
        kernel,
        out_shape=jax.ShapeDtypeStruct((Bp, Tp, Hp), o_dtype),
        grid_spec=pltpu.PrefetchScalarGridSpec(
            num_scalar_prefetch=0,
            grid=(Bp // batch_block,),
            in_specs=[
                pl.BlockSpec((batch_block, Tin, Hp), lambda b: (b, 0, 0)),   # x slab
                pl.BlockSpec((W, _PERIOD, Hp), lambda b: (0, 0, 0)),         # w_sel (period 24)
                pl.BlockSpec((_PERIOD, Hp), lambda b: (0, 0)),               # b_sel (period 24)
                pl.BlockSpec((Hp, Hp), lambda b: (0, 0)),                    # fc weight^T
                pl.BlockSpec((1, Hp), lambda b: (0, 0)),                     # fc bias
            ],
            out_specs=pl.BlockSpec((batch_block, Tp, Hp), lambda b: (b, 0, 0)),
        ),
        compiler_params=pltpu.CompilerParams(
            dimension_semantics=("parallel",),       # independent batch blocks
            vmem_limit_bytes=int(vmem_limit),
        ),
    )(xp, w_sel, b_sel, fc_wT, fc_b2)

    # NOTE: for lane-underfilled H (< 128) this slice is an extra HBM pass; callers
    # with small H in production should fold channel groups into the lane dimension.
    return out[:B, :T, :H]


def convolution_reference(x, conv_w, conv_b, fc_w, fc_b, *, window_size, conv_proj=True):
    """Pure-JAX f32 reference matching the PyTorch forward."""
    B, T, H = x.shape
    W = window_size
    xpad = jnp.pad(x.astype(jnp.float32), ((0, 0), (W - 1, 0), (0, 0)))
    out = jnp.zeros((B, T, H), jnp.float32)
    for m in range(3):
        y = conv_b[m][None, None, :].astype(jnp.float32)
        for k in range(W):
            y = y + conv_w[m, k][None, None, :].astype(jnp.float32) * xpad[:, k:k + T, :]
        mask = (jnp.arange(T) % 3 == m)[None, :, None]
        out = jnp.where(mask, y, out)
    if conv_proj:
        out = jnp.einsum("bth,oh->bto", out, fc_w.astype(jnp.float32),
                         precision=jax.lax.Precision.HIGHEST) + fc_b.astype(jnp.float32)
    return out.astype(x.dtype)


if __name__ == "__main__":
    # Small config consistent with the module: n_embd=32, window_size=4, seq length 9, batch 2.
    B, T, H, W = 2, 9, 32, 4
    conv_proj = True

    key = jax.random.PRNGKey(0)
    kx, kw, kb, kfw, kfb = jax.random.split(key, 5)

    x = jax.random.normal(kx, (B, T, H), dtype=jnp.float32)

    # Deterministic parameter init (torch-like uniform(-1/sqrt(fan_in), 1/sqrt(fan_in))).
    conv_bound = 1.0 / np.sqrt(1 * W)          # Conv1d fan_in = (in_channels/groups) * kernel
    conv_w = jax.random.uniform(kw, (3, W, H), jnp.float32, -conv_bound, conv_bound)
    conv_b = jax.random.uniform(kb, (3, H), jnp.float32, -conv_bound, conv_bound)
    fc_bound = 1.0 / np.sqrt(H)
    fc_w = jax.random.uniform(kfw, (H, H), jnp.float32, -fc_bound, fc_bound)   # torch (out, in)
    fc_b = jax.random.uniform(kfb, (H,), jnp.float32, -fc_bound, fc_bound)

    ref = convolution_reference(x, conv_w, conv_b, fc_w, fc_b,
                                window_size=W, conv_proj=conv_proj)

    # Default (full-f32, torch-parity) path.
    out = convolution_forward(x, conv_w, conv_b, fc_w, fc_b,
                              window_size=W, conv_proj=conv_proj)
    out = jax.block_until_ready(out)
    np.testing.assert_allclose(np.asarray(out), np.asarray(ref), rtol=1e-2, atol=1e-2)

    # Bandwidth-optimized path: bf16 input DMA + bf16 MXU inputs (f32 accumulate).
    out_bf16 = convolution_forward(x, conv_w, conv_b, fc_w, fc_b,
                                   window_size=W, conv_proj=conv_proj,
                                   input_dtype=jnp.bfloat16, use_bf16_matmul=True)
    out_bf16 = jax.block_until_ready(out_bf16)
    np.testing.assert_allclose(np.asarray(out_bf16), np.asarray(ref), rtol=5e-2, atol=5e-2)

    print("KERNEL_OK")
</pallas_src>

<mosaic_0001>
module attributes {stable_mosaic.version = 11 : i64} {
  func.func @_convolution_kernel(%arg0: i32, %arg1: memref<1x27x128xf32, #tpu.memory_space<vmem>>, %arg2: memref<4x24x128xf32, #tpu.memory_space<vmem>>, %arg3: memref<24x128xf32, #tpu.memory_space<vmem>>, %arg4: memref<128x128xf32, #tpu.memory_space<vmem>>, %arg5: memref<1x128xf32, #tpu.memory_space<vmem>>, %arg6: memref<1x24x128xf32, #tpu.memory_space<vmem>>) attributes {dimension_semantics = [#tpu.dimension_semantics<parallel>], iteration_bounds = array<i64: 2>, scalar_prefetch = 0 : i64, scratch_operands = 0 : i64, tpu.core_type = #tpu.core_type<tc>, window_params = [{transform_indices = @transform_0, window_bounds = array<i64: 1, 27, 128>}, {pipeline_mode = #tpu.pipeline_mode<synchronous>, transform_indices = @transform_1, window_bounds = array<i64: 4, 24, 128>}, {pipeline_mode = #tpu.pipeline_mode<synchronous>, transform_indices = @transform_2, window_bounds = array<i64: 24, 128>}, {pipeline_mode = #tpu.pipeline_mode<synchronous>, transform_indices = @transform_3, window_bounds = array<i64: 128, 128>}, {pipeline_mode = #tpu.pipeline_mode<synchronous>, transform_indices = @transform_4, window_bounds = array<i64: 1, 128>}, {transform_indices = @transform_5, window_bounds = array<i64: 1, 24, 128>}]} {
    %c0 = arith.constant 0 : index
    %c0_0 = arith.constant 0 : index
    %c0_1 = arith.constant 0 : index
    %0 = vector.load %arg2[%c0, %c0_0, %c0_1] : memref<4x24x128xf32, #tpu.memory_space<vmem>>, vector<4x24x128xf32>
    %c0_2 = arith.constant 0 : index
    %c0_3 = arith.constant 0 : index
    %1 = vector.load %arg3[%c0_2, %c0_3] : memref<24x128xf32, #tpu.memory_space<vmem>>, vector<24x128xf32>
    %2 = vector.shape_cast %1 : vector<24x128xf32> to vector<1x24x128xf32>
    %c0_4 = arith.constant 0 : index
    %c0_5 = arith.constant 0 : index
    %c0_6 = arith.constant 0 : index
    %3 = vector.load %arg1[%c0_4, %c0_5, %c0_6] : memref<1x27x128xf32, #tpu.memory_space<vmem>>, vector<1x24x128xf32>
    %4 = vector.extract_strided_slice %0 {offsets = [0, 0, 0], sizes = [1, 24, 128], strides = [1, 1, 1]} : vector<4x24x128xf32> to vector<1x24x128xf32>
    %5 = vector.shape_cast %4 : vector<1x24x128xf32> to vector<24x128xf32>
    %6 = vector.shape_cast %5 : vector<24x128xf32> to vector<1x24x128xf32>
    %7 = arith.mulf %6, %3 : vector<1x24x128xf32>
    %8 = arith.addf %2, %7 : vector<1x24x128xf32>
    %c0_7 = arith.constant 0 : index
    %c1 = arith.constant 1 : index
    %c0_8 = arith.constant 0 : index
    %9 = vector.load %arg1[%c0_7, %c1, %c0_8] : memref<1x27x128xf32, #tpu.memory_space<vmem>>, vector<1x24x128xf32>
    %10 = vector.extract_strided_slice %0 {offsets = [1, 0, 0], sizes = [1, 24, 128], strides = [1, 1, 1]} : vector<4x24x128xf32> to vector<1x24x128xf32>
    %11 = vector.shape_cast %10 : vector<1x24x128xf32> to vector<24x128xf32>
    %12 = vector.shape_cast %11 : vector<24x128xf32> to vector<1x24x128xf32>
    %13 = arith.mulf %12, %9 : vector<1x24x128xf32>
    %14 = arith.addf %8, %13 : vector<1x24x128xf32>
    %c0_9 = arith.constant 0 : index
    %c2 = arith.constant 2 : index
    %c0_10 = arith.constant 0 : index
    %15 = vector.load %arg1[%c0_9, %c2, %c0_10] : memref<1x27x128xf32, #tpu.memory_space<vmem>>, vector<1x24x128xf32>
    %16 = vector.extract_strided_slice %0 {offsets = [2, 0, 0], sizes = [1, 24, 128], strides = [1, 1, 1]} : vector<4x24x128xf32> to vector<1x24x128xf32>
    %17 = vector.shape_cast %16 : vector<1x24x128xf32> to vector<24x128xf32>
    %18 = vector.shape_cast %17 : vector<24x128xf32> to vector<1x24x128xf32>
    %19 = arith.mulf %18, %15 : vector<1x24x128xf32>
    %20 = arith.addf %14, %19 : vector<1x24x128xf32>
    %c0_11 = arith.constant 0 : index
    %c3 = arith.constant 3 : index
    %c0_12 = arith.constant 0 : index
    %21 = vector.load %arg1[%c0_11, %c3, %c0_12] : memref<1x27x128xf32, #tpu.memory_space<vmem>>, vector<1x24x128xf32>
    %22 = vector.extract_strided_slice %0 {offsets = [3, 0, 0], sizes = [1, 24, 128], strides = [1, 1, 1]} : vector<4x24x128xf32> to vector<1x24x128xf32>
    %23 = vector.shape_cast %22 : vector<1x24x128xf32> to vector<24x128xf32>
    %24 = vector.shape_cast %23 : vector<24x128xf32> to vector<1x24x128xf32>
    %25 = arith.mulf %24, %21 : vector<1x24x128xf32>
    %26 = arith.addf %20, %25 : vector<1x24x128xf32>
    %27 = vector.shape_cast %26 : vector<1x24x128xf32> to vector<24x128xf32>
    %c0_13 = arith.constant 0 : index
    %c0_14 = arith.constant 0 : index
    %28 = vector.load %arg4[%c0_13, %c0_14] : memref<128x128xf32, #tpu.memory_space<vmem>>, vector<128x128xf32>
    %cst = arith.constant dense<0.000000e+00> : vector<24x128xf32>
    %29 = tpu.matmul %27, %28, %cst {dimension_numbers = #tpu.dot_dimension_numbers<[1], [0], [0], [1], [0, 0, 1, 1], [], []>} : vector<24x128xf32>, vector<128x128xf32>, vector<24x128xf32> -> vector<24x128xf32>
    %c0_15 = arith.constant 0 : index
    %c0_16 = arith.constant 0 : index
    %30 = vector.load %arg5[%c0_15, %c0_16] : memref<1x128xf32, #tpu.memory_space<vmem>>, vector<1x128xf32>
    %31 = vector.broadcast %30 : vector<1x128xf32> to vector<24x128xf32>
    %32 = arith.addf %29, %31 : vector<24x128xf32>
    %33 = vector.shape_cast %32 : vector<24x128xf32> to vector<1x24x128xf32>
    %c0_17 = arith.constant 0 : index
    %c0_18 = arith.constant 0 : index
    %c0_19 = arith.constant 0 : index
    %34 = vector.load %arg6[%c0_17, %c0_18, %c0_19] : memref<1x24x128xf32, #tpu.memory_space<vmem>>, vector<1x24x128xf32>
    tpu.vector_store %arg6[%c0_17, %c0_18, %c0_19], %33 {strides = array<i32>} : memref<1x24x128xf32, #tpu.memory_space<vmem>>, vector<1x24x128xf32>,
    return
  }
  func.func @transform_0(%arg0: i32) -> (i32, i32, i32) {
    %c0_i32 = arith.constant 0 : i32
    %c0_i32_0 = arith.constant 0 : i32
    %c0_i32_1 = arith.constant 0 : i32
    return %arg0, %c0_i32, %c0_i32_0 : i32, i32, i32
  }
  func.func @transform_1(%arg0: i32) -> (i32, i32, i32) {
    %c0_i32 = arith.constant 0 : i32
    %c0_i32_0 = arith.constant 0 : i32
    %c0_i32_1 = arith.constant 0 : i32
    %c0_i32_2 = arith.constant 0 : i32
    return %c0_i32, %c0_i32_0, %c0_i32_1 : i32, i32, i32
  }
  func.func @transform_2(%arg0: i32) -> (i32, i32) {
    %c0_i32 = arith.constant 0 : i32
    %c0_i32_0 = arith.constant 0 : i32
    %c0_i32_1 = arith.constant 0 : i32
    return %c0_i32, %c0_i32_0 : i32, i32
  }
  func.func @transform_3(%arg0: i32) -> (i32, i32) {
    %c0_i32 = arith.constant 0 : i32
    %c0_i32_0 = arith.constant 0 : i32
    %c0_i32_1 = arith.constant 0 : i32
    return %c0_i32, %c0_i32_0 : i32, i32
  }
  func.func @transform_4(%arg0: i32) -> (i32, i32) {
    %c0_i32 = arith.constant 0 : i32
    %c0_i32_0 = arith.constant 0 : i32
    %c0_i32_1 = arith.constant 0 : i32
    return %c0_i32, %c0_i32_0 : i32, i32
  }
  func.func @transform_5(%arg0: i32) -> (i32, i32, i32) {
    %c0_i32 = arith.constant 0 : i32
    %c0_i32_0 = arith.constant 0 : i32
    %c0_i32_1 = arith.constant 0 : i32
    return %arg0, %c0_i32, %c0_i32_0 : i32, i32, i32
  }
}

</mosaic_0001>

<bundles_post_ra>
// kernel: tpu_custom_call.1
= control target key start
LH: loop header
LB: loop body
LE: loop exit
PB: predicated region body
PF: predicated region fallthrough
CT: control target
= control target key end

     0   :  { %10 = vsyncpa [#allocation3], 0  ;;  %s901_s0 = inlined_call_operand.vmem [shape: f32[2,27,128], index: 0, kind: input, shape index: {}]   ;;  %s902_s1 = inlined_call_operand.vmem [shape: f32[4,24,128], index: 1, kind: input, shape index: {}]   ;;  %s903_s2 = inlined_call_operand.hbm [shape: f32[24,128], index: 2, kind: input, shape index: {}]   ;;  %s904_s3 = inlined_call_operand.hbm [shape: f32[128,128], index: 3, kind: input, shape index: {}]   ;;  %s905_s4 = inlined_call_operand.vmem [shape: f32[1,128], index: 4, kind: input, shape index: {}]   ;;  %s906_s5 = inlined_call_operand.hbm [shape: f32[2,24,128], index: 5, kind: output, shape index: {}]  }
   0x1   :  { %11 = vsyncpa [#allocation6], 0 }
   0x2   :  { %12 = vsyncpa [#allocation4], 0 }
   0x3   :  { %14 = vsyncpa [#allocation4 + $0x1], 0  ;;  %s738_s18 = smov 0   ;;  %s740_s19 = smov 0  }
   0x4   :  { %s742_s20 = smov 0   ;;  %s744_s21 = smov 0  }
   0x5 LB: > { %s759_s22 = sadd.s32 4294967295, %s700_s21   ;;  %s457_s23 = sadd.s32 4294967294, %s700_s21   ;;  %s700_s21 = sphi %s744_s21, %s913_s21   ;;  %s696_s20 = sphi %s742_s20, %s912_s20   ;;  %s692_s19 = sphi %s740_s19, %s911_s19   ;;  %s688_s18 = sphi %s738_s18, %s910_s18  }
   0x6   : > { %s763_s24 = sadd.s32 1, %s700_s21   ;;  %s137_s25 = sadd.s32 1, %s696_s20 }
   0x7   : > { %s134_s26 = ssub.s32 %s700_s21, %s763_s24  ;;  %p147_p0 = scmp.ne.s32.totalorder %s696_s20, %s692_s19 }
   0x8   : > { %p135_p1 = scmp.eq.s32.totalorder %s134_s26, 0  ;;  %p148_p2 = scmp.eq.s32.totalorder %s759_s22, 1 }
   0x9   : > { %p153_p3 = scmp.ne.s32.totalorder %s692_s19, %s688_s18  ;;  %p154_p4 = scmp.eq.s32.totalorder %s457_s23, 1 }
   0xa   : > { %s774_s27 = scalar_select %p135_p1, %s696_s20, %s137_s25  }
   0xb   : > { %p776_p5 = por %p148_p2, %p147_p0  ;;  %p780_p6 = por %p154_p4, %p153_p3 }
   0xc   : > { %p458_p7 = scmp.ge.s32.totalorder %s700_s21, 1  ;;  %p161_p8 = scmp.lt.s32.totalorder %s700_s21, 3 }
   0xd   : > { %p526_p9 = scmp.eq.s32.totalorder %s759_s22, 0  ;;  %s175_s8 = sshll.u32 %s903_s2, 4  ;;  %s176_s8 = int_to_ptr.hbm [resolvable:$true] %s175_s8 }
   0xe   : > { %p787_p10 = pnand %p458_p7, %p161_p8  ;;  %s702_s9 = smov [#allocation2]  }
   0xf   : > { %s177_s10 = sshll.u32 %s702_s9, 4  ;;  %s189_s13 = sshll.u32 %s904_s3, 4  ;;  %s178_s10 = int_to_ptr.vmem [resolvable:$true] %s177_s10  ;;  %s190_s13 = int_to_ptr.hbm [resolvable:$true] %s189_s13 }
  0x10   : > { %p515_p11 = pneg %p787_p10  ;;  %s703_s14 = smov 128  }
  0x11   : > { %s704_s15 = smov 8   ;;  %s705_s16 = smov [#allocation5]  }
  0x12   : > { %p516_p12 = pnand %p526_p9, %p515_p11  ;;  %s191_s17 = sshll.u32 %s705_s16, 4  ;;  %s192_s17 = int_to_ptr.vmem [resolvable:$true] %s191_s17 }
  0x13   : > { %218 = sbr.rel (%p787_p10) target bundleno = 197 (0xc5), region = 40 }
  0x14   : > { %518 = dma.hbm_to_vmem [thread:$0]  (!%p516_p12), %s176_s8, 384, %s178_s10, [#allocation3], %s703_s14, %s703_s14, %s704_s15  }
  0x15   : > { %521 = dma.hbm_to_vmem [thread:$0]  (!%p516_p12), %s190_s13, 2048, %s192_s17, [#allocation6], %s703_s14, %s703_s14, %s704_s15  }
  0x18   : > { %675 = dma.done.wait (%p526_p9), [#allocation3], 384  }
  0x19   : > { %677 = vsyncadd (%p526_p9), [#allocation3], 4294966912 }
  0x1a   : > { %679 = dma.done.wait (%p526_p9), [#allocation6], 2048  }
  0x1b   : > { %681 = vsyncadd (%p526_p9), [#allocation6], 4294965248  ;;  %p252_p13 = scmp.lt.s32.totalorder %s759_s22, 1  ;;  %v323_v0 = vld [vmem:[#allocation5 + $0x78] sm:$0xff]  ;;  %v322_v1 = vld [vmem:[#allocation5 + $0x70] sm:$0xff]  ;;  %s504_s17 = smul.u32 24, %s759_s22 }
  0x1c   : > { %472 = vmatpush.msra.mxu2 %v323_v0  ;;  %328 = vmatpush.msra.mxu0 %v323_v0  ;;  %v321_v2 = vld [vmem:[#allocation5 + $0x68] sm:$0xff]  ;;  %v320_v3 = vld [vmem:[#allocation5 + $0x60] sm:$0xff]  ;;  %v319_v4 = vld [vmem:[#allocation5 + $0x58] sm:$0xff]  ;;  %s650_s15 = scalar_lea.hbm %s906_s5, 48 }
  0x1d   : > { %s253_s23 = scalar_select %p252_p13, %s759_s22, 1  ;;  %471 = vmatpush.msra.mxu1 %v323_v0  ;;  %v318_v5 = vld [vmem:[#allocation5 + $0x50] sm:$0xff]  ;;  %v317_v6 = vld [vmem:[#allocation5 + $0x48] sm:$0xff]  ;;  %v259_v7 = vld [vmem:[%s902_s1 + $0x10] sm:$0xff] }
  0x1e   : > { %474 = vmatpush.msra.mxu2 %v322_v1  ;;  %329 = vmatpush.msra.mxu0 %v322_v1  ;;  %v316_v9 = vld [vmem:[#allocation5 + $0x40] sm:$0xff]  ;;  %v257_v10 = vld [vmem:[%s902_s1] sm:$0xff]  ;;  %v262_v12 = vld [vmem:[%s902_s1 + $0x28] sm:$0xff]  ;;  %s369_s7 = scalar_lea.hbm %s906_s5, %s504_s17 }
  0x1f   : > { %s470_s25 = sshll.u32 %s253_s23, 5  ;;  %473 = vmatpush.msra.mxu1 %v322_v1  ;;  %v271_v13 = vld [vmem:[#allocation2 + $0x10] sm:$0xff]  ;;  %v258_v14 = vld [vmem:[%s902_s1 + $0x8] sm:$0xff]  ;;  %v260_v18 = vld [vmem:[%s902_s1 + $0x18] sm:$0xff]  ;;  %s372_s10 = sshll.u32 %s369_s7, 4  ;;  %s373_s10 = int_to_ptr.hbm [resolvable:$true] %s372_s10 }
  0x20   : > { %476 = vmatpush.msra.mxu2 %v321_v2  ;;  %330 = vmatpush.msra.mxu0 %v321_v2  ;;  %s816_s6 = scalar_lea.vmem %s901_s0, %s470_s25  ;;  %v315_v15 = vld [vmem:[#allocation5 + $0x38] sm:$0xff]  ;;  %v269_v19 = vld [vmem:[#allocation2] sm:$0xff]  ;;  %v270_v24 = vld [vmem:[#allocation2 + $0x8] sm:$0xff]  ;;  %s644_s11 = sshra.s32 %s373_s10, 4  ;;  %s645_s11 = int_to_ptr.hbm [resolvable:$true] %s644_s11 }
  0x21   : > { %475 = vmatpush.msra.mxu1 %v321_v2  ;;  %v274_v8 = vld [vmem:[%s816_s6 + $0x10] sm:$0xff]  ;;  %v272_v11 = vld [vmem:[%s816_s6] sm:$0xff]  ;;  %v273_v23 = vld [vmem:[%s816_s6 + $0x8] sm:$0xff]  ;;  %s646_s12 = scalar_lea.hbm %s645_s11, 24  ;;  %p651_p3 = scmp.lt.s32.totalorder %s645_s11, %s906_s5 }
  0x22   : > { %478 = vmatpush.msra.mxu2 %v320_v3  ;;  %331 = vmatpush.msra.mxu0 %v320_v3  ;;  %v277_v16 = vmul.f32 %v274_v8, %v259_v7  ;;  %v283_v17 = vld [vmem:[%s816_s6 + $0x11] sm:$0xff]  ;;  %v275_v20 = vmul.f32 %v272_v11, %v257_v10  ;;  %v281_v21 = vld [vmem:[%s816_s6 + $0x1] sm:$0xff]  ;;  %v276_v25 = vmul.f32 %v273_v23, %v258_v14  ;;  %v282_v26 = vld [vmem:[%s816_s6 + $0x9] sm:$0xff]  ;;  %p647_p0 = scmp.ne.s32.totalorder %s645_s11, %s646_s12  ;;  %p652_p4 = scmp.lt.s32.totalorder %s650_s15, %s646_s12 }
  0x23   : > { %477 = vmatpush.msra.mxu1 %v320_v3  ;;  %v261_v22 = vld [vmem:[%s902_s1 + $0x20] sm:$0xff]  ;;  %v314_v27 = vld [vmem:[#allocation5 + $0x30] sm:$0xff]  ;;  %v286_v30 = vmul.f32 %v283_v17, %v262_v12  ;;  %v284_v31 = vmul.f32 %v281_v21, %v260_v18  ;;  %v292_v32 = vld [vmem:[%s816_s6 + $0x12] sm:$0xff] }
  0x24   : > { %480 = vmatpush.msra.mxu2 %v319_v4  ;;  %332 = vmatpush.msra.mxu0 %v319_v4  ;;  %v265_v28 = vld [vmem:[%s902_s1 + $0x40] sm:$0xff]  ;;  %v280_v29 = vadd.f32 %v277_v16, %v271_v13  ;;  %v263_v33 = vld [vmem:[%s902_s1 + $0x30] sm:$0xff]  ;;  %v278_v34 = vadd.f32 %v275_v20, %v269_v19  ;;  %v279_v36 = vadd.f32 %v276_v25, %v270_v24  ;;  %v264_v39 = vld [vmem:[%s902_s1 + $0x38] sm:$0xff]  ;;  %p648_p1 = pnand %p647_p0, %p776_p5  ;;  %p653_p7 = por %p652_p4, %p651_p3 }
  0x25   : > { %479 = vmatpush.msra.mxu1 %v319_v4  ;;  %v290_v35 = vld [vmem:[%s816_s6 + $0x2] sm:$0xff]  ;;  %v285_v37 = vmul.f32 %v282_v26, %v261_v22  ;;  %v291_v40 = vld [vmem:[%s816_s6 + $0xa] sm:$0xff]  ;;  %v312_v41 = vld [vmem:[#allocation5 + $0x20] sm:$0xff]  ;;  %v295_v44 = vmul.f32 %v292_v32, %v265_v28 }
  0x26   : > { %482 = vmatpush.msra.mxu2 %v318_v5  ;;  %333 = vmatpush.msra.mxu0 %v318_v5  ;;  %v313_v38 = vld [vmem:[#allocation5 + $0x28] sm:$0xff]  ;;  %v268_v42 = vld [vmem:[%s902_s1 + $0x58] sm:$0xff]  ;;  %v289_v43 = vadd.f32 %v286_v30, %v280_v29  ;;  %v293_v45 = vmul.f32 %v290_v35, %v263_v33  ;;  %v266_v47 = vld [vmem:[%s902_s1 + $0x48] sm:$0xff]  ;;  %v287_v48 = vadd.f32 %v284_v31, %v278_v34  ;;  %p649_p2 = pneg %p648_p1 }
  0x27   : > { %481 = vmatpush.msra.mxu1 %v318_v5  ;;  %v301_v46 = vld [vmem:[%s816_s6 + $0x13] sm:$0xff]  ;;  %v299_v49 = vld [vmem:[%s816_s6 + $0x3] sm:$0xff]  ;;  %v288_v50 = vadd.f32 %v285_v37, %v279_v36  ;;  %v294_v51 = vmul.f32 %v291_v40, %v264_v39  ;;  %v300_v54 = vld [vmem:[%s816_s6 + $0xb] sm:$0xff]  ;;  %s249_s6 = sand.u32 1, %s692_s19  }
  0x28   : > { %484 = vmatpush.msra.mxu2 %v317_v6  ;;  %334 = vmatpush.msra.mxu0 %v317_v6  ;;  %v311_v52 = vld [vmem:[#allocation5 + $0x18] sm:$0xff]  ;;  %v310_v55 = vld [vmem:[#allocation5 + $0x10] sm:$0xff]  ;;  %v298_v56 = vadd.f32 %v295_v44, %v289_v43  ;;  %v304_v57 = vmul.f32 %v301_v46, %v268_v42  ;;  %v302_v58 = vmul.f32 %v299_v49, %v266_v47  ;;  %v309_v62 = vld [vmem:[#allocation5 + $0x8] sm:$0xff]  ;;  %s503_s16 = smul.u32 24, %s249_s6  ;;  %s358_s22 = scalar_lea.sflag [#allocation4], %s249_s6 }
  0x29   : > { %483 = vmatpush.msra.mxu1 %v317_v6  ;;  %v267_v53 = vld [vmem:[%s902_s1 + $0x50] sm:$0xff]  ;;  %v296_v59 = vadd.f32 %v293_v45, %v287_v48  ;;  %v297_v60 = vadd.f32 %v294_v51, %v288_v50  ;;  %v308_v63 = vld [vmem:[#allocation5] sm:$0xff]  ;;  %v569_v3 = vld [vmem:[%s905_s4] ss:$0 sm:$0xff]  ;;  %p654_p8 = pnand %p653_p7, %p649_p2 }
  0x2a   : > { %486 = vmatpush.msra.mxu2 %v316_v9  ;;  %335 = vmatpush.msra.mxu0 %v316_v9  ;;  %v303_v61 = vmul.f32 %v300_v54, %v267_v53  ;;  %v307_v0 = vadd.f32 %v304_v57, %v298_v56  ;;  %s251_s8 = scalar_lea.vmem [#allocation7], %s503_s16 }
  0x2b   : > { %485 = vmatpush.msra.mxu1 %v316_v9  ;;  %v305_v1 = vadd.f32 %v302_v58, %v296_v59  ;;  %s370_s9 = sshll.u32 %s251_s8, 4  ;;  %s371_s9 = int_to_ptr.vmem [resolvable:$true] %s370_s9 }
  0x2c   : > { %488 = vmatpush.msra.mxu2 %v315_v15  ;;  %336 = vmatpush.msra.mxu0 %v315_v15  ;;  %v306_v2 = vadd.f32 %v303_v61, %v297_v60 }
  0x2d   : > { %487 = vmatpush.msra.mxu1 %v315_v15 }
  0x2e   : > { %490 = vmatpush.msra.mxu2 %v314_v27  ;;  %337 = vmatpush.msra.mxu0 %v314_v27 }
  0x2f   : > { %489 = vmatpush.msra.mxu1 %v314_v27 }
  0x30   : > { %492 = vmatpush.msra.mxu2 %v313_v38  ;;  %338 = vmatpush.msra.mxu0 %v313_v38 }
  0x31   : > { %491 = vmatpush.msra.mxu1 %v313_v38 }
  0x32   : > { %494 = vmatpush.msra.mxu2 %v312_v41  ;;  %339 = vmatpush.msra.mxu0 %v312_v41 }
  0x33   : > { %493 = vmatpush.msra.mxu1 %v312_v41 }
  0x34   : > { %496 = vmatpush.msra.mxu2 %v311_v52  ;;  %340 = vmatpush.msra.mxu0 %v311_v52 }
  0x35   : > { %495 = vmatpush.msra.mxu1 %v311_v52 }
  0x36   : > { %498 = vmatpush.msra.mxu2 %v310_v55  ;;  %341 = vmatpush.msra.mxu0 %v310_v55 }
  0x37   : > { %497 = vmatpush.msra.mxu1 %v310_v55 }
  0x38   : > { %500 = vmatpush.msra.mxu2 %v309_v62  ;;  %342 = vmatpush.msra.mxu0 %v309_v62 }
  0x39   : > { %499 = vmatpush.msra.mxu1 %v309_v62 }
  0x3a   : > { %502 = vmatpush.msra.mxu2 %v308_v63  ;;  %343 = vmatpush.msra.mxu0 %v308_v63 }
  0x3b   : > { %350 = vmatmul.f32.vlgmr.msra.gmra.mxu2 %v307_v0  ;;  %501 = vmatpush.msra.mxu1 %v308_v63 }
  0x3c   : > { %344 = vmatmul.f32.vlgmr.msra.gmra.mxu0 %v305_v1  ;;  %347 = vmatmul.f32.vlgmr.msra.gmra.mxu1 %v306_v2 }
  0xb9   : > { %v345_v4 = vpop.f32.mrf.mxu0  ;;  %v348_v5 = vpop.f32.mrf.mxu1 }
  0xba   : > { %v346_v6 = vadd.f32 %v569_v3, %v345_v4  ;;  %v349_v7 = vadd.f32 %v569_v3, %v348_v5 }
  0xbc   : > { %354 = vst [vmem:[%s251_s8] sm:$0xff] %v346_v6 }
  0xbd   : > { %355 = vst [vmem:[%s251_s8 + $0x8] sm:$0xff] %v349_v7 }
  0xbe   : > { %v351_v8 = vpop.f32.mrf.mxu2 }
  0xbf   : > { %v352_v9 = vadd.f32 %v569_v3, %v351_v8 }
  0xc1   : > { %356 = vst [vmem:[%s251_s8 + $0x10] sm:$0xff] %v352_v9 }
  0xc2   : > { %657 = shalt.err (!%p654_p8)
}
  0xc3   : > { %s706_s6 = smov 128   ;;  %s707_s23 = smov 8  }
  0xc4   : > { %513 = dma.vmem_to_hbm [thread:$0]  (%p776_p5), %s371_s9, 384, %s373_s10, %s358_s22, %s706_s6, %s706_s6, %s707_s23  }
  0xc5 PF: > { %p530_p9 = scmp.ge.s32.totalorder %s700_s21, 2  ;;  %s387_s25 = sand.u32 1, %s688_s18  }
  0xc6   : > { %s388_s26 = scalar_lea.sflag [#allocation4], %s387_s25 }
  0xc7   : > { %p523_p10 = pnand %p530_p9, %p780_p6 }
  0xc9   : > { %p524_p11 = pneg %p523_p10 }
  0xcb   : > { %683 = dma.done.wait (%p524_p11), %s388_s26, 384  }
  0xcc   : > { %685 = vsyncadd (%p524_p11), %s388_s26, 4294966912  ;;  %p17_p12 = scmp.ge.s32.totalorder %s763_s24, 4   ;;  %s910_s18 = smov %s692_s19 }
  0xcd   : > { %s911_s19 = smov %s696_s20  ;;  %s912_s20 = smov %s774_s27 }
  0xce   : > { %s913_s21 = smov %s763_s24  ;;  %19 = sbr.rel (!%p17_p12) target bundleno = 5 (0x5), region = 84 }
  0xd3   :  { %394 = vsyncpa [#allocation3], 1 }
  0xd4   :  { %396 = vsyncpa [#allocation3 + $0x1], 1 }
  0xd5   :  { %397 = vsyncpa [#allocation6], 1 }
  0xd6   :  { %398 = vsyncpa [#allocation4], 1 }
  0xd7   :  { %400 = vsyncpa [#allocation4 + $0x1], 1 }

</bundles_post_ra>
